<compile_context>
chip_gen: v6e
topology: v6e:2x2x1
jax: 0.10.0
libtpu: 0.0.40
codegen_flags: <defaults>
</compile_context>

<pallas_src>
import functools

import jax
import jax.numpy as jnp
from jax.experimental import pallas as pl
from jax.experimental.pallas import tpu as pltpu

_LANE = 128
_SUBLANE = 8


def _absmax_kernel(x_ref, t_ref, out_ref, *, tile_rows, rows, needs_mask):
    ad = jnp.abs(x_ref[...].astype(jnp.float32) - t_ref[...].astype(jnp.float32))
    if needs_mask:
        r = jax.lax.broadcasted_iota(jnp.int32, (tile_rows, _LANE), 0)
        valid = (pl.program_id(0) * tile_rows + r) < rows
        ad = jnp.where(valid, ad, 0.0)  # absdiff >= 0, so 0 is a safe max identity
    # (tile_rows, 128) -> (tile_rows//8, 8, 128); reducing the leading axis is
    # a chain of elementwise vreg maxes (pure VPU, no XLU in the hot loop).
    out_ref[...] = jnp.max(ad.reshape(tile_rows // _SUBLANE, _SUBLANE, _LANE), axis=0)


def _berhu_sum_kernel(cp_ref, x_ref, t_ref, out_ref, *, tile_rows, rows, needs_mask):
    c = cp_ref[0]       # C
    half_c = cp_ref[1]  # C / 2
    inv_2c = cp_ref[2]  # 1 / (2C)
    ad = jnp.abs(x_ref[...].astype(jnp.float32) - t_ref[...].astype(jnp.float32))
    # (a^2 + C^2) / (2C) == a^2 * (1/(2C)) + C/2  -> no per-element divide.
    val = jnp.where(ad < c, ad, ad * ad * inv_2c + half_c)
    if needs_mask:
        r = jax.lax.broadcasted_iota(jnp.int32, (tile_rows, _LANE), 0)
        valid = (pl.program_id(0) * tile_rows + r) < rows
        val = jnp.where(valid, val, 0.0)
    out_ref[...] = jnp.sum(val.reshape(tile_rows // _SUBLANE, _SUBLANE, _LANE), axis=0)


def inverse_huber_loss(inp, target, *, tile_rows=1024):
    assert inp.shape == target.shape, "input/target shape mismatch"
    n = inp.size
    # Keep native dtype in HBM; the kernels upcast to f32 per-vreg on the VPU.
    x = inp.reshape(-1)
    t = target.reshape(-1)
    in_itemsize = jnp.dtype(x.dtype).itemsize

    # Lane pad only when n is not a multiple of 128 (no full-tile padded copy).
    # Pad zeros give absdiff == 0: neutral for the max and 0 in the linear
    # branch of the sum whenever C > 0 (the C == 0 case is NaN, as in torch).
    rem = n % _LANE
    if rem:
        pad = _LANE - rem
        x = jnp.concatenate([x, jnp.zeros((pad,), x.dtype)])
        t = jnp.concatenate([t, jnp.zeros((pad,), t.dtype)])
    rows = x.size // _LANE
    x = x.reshape(rows, _LANE)
    t = t.reshape(rows, _LANE)

    # Big blocks to amortize per-step overhead, clamped to the (sublane-rounded)
    # problem size so small inputs get an exact single tile.
    tile_rows = max(_SUBLANE, (tile_rows // _SUBLANE) * _SUBLANE)
    tile_rows = min(tile_rows, pl.cdiv(rows, _SUBLANE) * _SUBLANE)
    num_tiles = pl.cdiv(rows, tile_rows)
    needs_mask = num_tiles * tile_rows != rows  # ragged last tile -> mask rows

    in_block = pl.BlockSpec((tile_rows, _LANE), lambda i: (i, 0))
    out_block = pl.BlockSpec((_SUBLANE, _LANE), lambda i: (i, 0))
    out_shape = jax.ShapeDtypeStruct((num_tiles * _SUBLANE, _LANE), jnp.float32)
    in_bytes = 2 * n * in_itemsize
    partial_bytes = num_tiles * _SUBLANE * _LANE * 4
    cparams_compiler = pltpu.CompilerParams(dimension_semantics=("parallel",))

    # ---- pass 1: global max of |x - t| (per-tile partials) ----
    pmax = pl.pallas_call(
        functools.partial(
            _absmax_kernel, tile_rows=tile_rows, rows=rows, needs_mask=needs_mask
        ),
        out_shape=out_shape,
        grid=(num_tiles,),
        in_specs=[in_block, in_block],
        out_specs=out_block,
        compiler_params=cparams_compiler,
        cost_estimate=pl.CostEstimate(
            flops=3 * n, transcendentals=0, bytes_accessed=in_bytes + partial_bytes
        ),
    )(x, t)

    c = 0.2 * jnp.max(pmax)
    cparams = jnp.stack([c, 0.5 * c, 1.0 / (2.0 * c)]).astype(jnp.float32)

    # ---- pass 2: berHu partial sums ----
    psum = pl.pallas_call(
        functools.partial(
            _berhu_sum_kernel, tile_rows=tile_rows, rows=rows, needs_mask=needs_mask
        ),
        out_shape=out_shape,
        grid=(num_tiles,),
        in_specs=[
            pl.BlockSpec(memory_space=pltpu.MemorySpace.SMEM),  # [C, C/2, 1/(2C)]
            in_block,
            in_block,
        ],
        out_specs=out_block,
        compiler_params=cparams_compiler,
        cost_estimate=pl.CostEstimate(
            flops=7 * n, transcendentals=0, bytes_accessed=in_bytes + partial_bytes
        ),
    )(cparams, x, t)

    return jnp.sum(psum) / n


def _reference(inp, target):
    absdiff = jnp.abs(inp.astype(jnp.float32) - target.astype(jnp.float32))
    C = 0.2 * jnp.max(absdiff)
    return jnp.mean(
        jnp.where(absdiff < C, absdiff, (absdiff * absdiff + C * C) / (2.0 * C))
    )


if __name__ == "__main__":
    key = jax.random.PRNGKey(0)
    k1, k2 = jax.random.split(key)
    # Depth-map style inputs (NCHW in the PyTorch world); the loss is
    # layout-agnostic since it is a global elementwise reduction.
    shape = (2, 4, 16, 16)
    inp = jax.random.normal(k1, shape, dtype=jnp.float32)
    tgt = jax.random.normal(k2, shape, dtype=jnp.float32)

    loss = jax.jit(inverse_huber_loss)(inp, tgt)
    loss = jax.block_until_ready(loss)

    ref = _reference(inp, tgt)
    assert jnp.allclose(loss, ref, rtol=1e-5, atol=1e-6), (loss, ref)
    print("KERNEL_OK")
</pallas_src>

<mosaic_0001>
module attributes {stable_mosaic.version = 11 : i64} {
  func.func @_absmax_kernel(%arg0: i32, %arg1: memref<16x128xf32, #tpu.memory_space<vmem>>, %arg2: memref<16x128xf32, #tpu.memory_space<vmem>>, %arg3: memref<8x128xf32, #tpu.memory_space<vmem>>) attributes {dimension_semantics = [#tpu.dimension_semantics<parallel>], iteration_bounds = array<i64: 1>, scalar_prefetch = 0 : i64, scratch_operands = 0 : i64, tpu.core_type = #tpu.core_type<tc>, window_params = [{transform_indices = @transform_0, window_bounds = array<i64: 16, 128>}, {transform_indices = @transform_1, window_bounds = array<i64: 16, 128>}, {transform_indices = @transform_2, window_bounds = array<i64: 8, 128>}]} {
    %c0 = arith.constant 0 : index
    %c0_0 = arith.constant 0 : index
    %0 = vector.load %arg1[%c0, %c0_0] : memref<16x128xf32, #tpu.memory_space<vmem>>, vector<16x128xf32>
    %c0_1 = arith.constant 0 : index
    %c0_2 = arith.constant 0 : index
    %1 = vector.load %arg2[%c0_1, %c0_2] : memref<16x128xf32, #tpu.memory_space<vmem>>, vector<16x128xf32>
    %2 = arith.subf %0, %1 : vector<16x128xf32>
    %3 = math.absf %2 : vector<16x128xf32>
    %4 = vector.shape_cast %3 : vector<16x128xf32> to vector<2x8x128xf32>
    %cst = arith.constant dense<0xFF800000> : vector<8x128xf32>
    %5 = vector.multi_reduction <maximumf>, %4, %cst [0] : vector<2x8x128xf32> to vector<8x128xf32>
    %c0_3 = arith.constant 0 : index
    %c0_4 = arith.constant 0 : index
    %6 = vector.load %arg3[%c0_3, %c0_4] : memref<8x128xf32, #tpu.memory_space<vmem>>, vector<8x128xf32>
    tpu.vector_store %arg3[%c0_3, %c0_4], %5 {strides = array<i32>} : memref<8x128xf32, #tpu.memory_space<vmem>>, vector<8x128xf32>,
    return
  }
  func.func @transform_0(%arg0: i32) -> (i32, i32) {
    %c0_i32 = arith.constant 0 : i32
    %c0_i32_0 = arith.constant 0 : i32
    return %arg0, %c0_i32 : i32, i32
  }
  func.func @transform_1(%arg0: i32) -> (i32, i32) {
    %c0_i32 = arith.constant 0 : i32
    %c0_i32_0 = arith.constant 0 : i32
    return %arg0, %c0_i32 : i32, i32
  }
  func.func @transform_2(%arg0: i32) -> (i32, i32) {
    %c0_i32 = arith.constant 0 : i32
    %c0_i32_0 = arith.constant 0 : i32
    return %arg0, %c0_i32 : i32, i32
  }
}

module attributes {stable_mosaic.version = 11 : i64} {
  func.func @_berhu_sum_kernel(%arg0: i32, %arg1: memref<3xf32, #tpu.memory_space<smem>>, %arg2: memref<16x128xf32, #tpu.memory_space<vmem>>, %arg3: memref<16x128xf32, #tpu.memory_space<vmem>>, %arg4: memref<8x128xf32, #tpu.memory_space<vmem>>) attributes {dimension_semantics = [#tpu.dimension_semantics<parallel>], iteration_bounds = array<i64: 1>, scalar_prefetch = 0 : i64, scratch_operands = 0 : i64, tpu.core_type = #tpu.core_type<tc>, window_params = [{transform_indices = @transform_0, window_bounds = array<i64: 3>}, {transform_indices = @transform_1, window_bounds = array<i64: 16, 128>}, {transform_indices = @transform_2, window_bounds = array<i64: 16, 128>}, {transform_indices = @transform_3, window_bounds = array<i64: 8, 128>}]} {
    %c0 = arith.constant 0 : index
    %0 = memref.load %arg1[%c0] : memref<3xf32, #tpu.memory_space<smem>>
    %c1 = arith.constant 1 : index
    %1 = memref.load %arg1[%c1] : memref<3xf32, #tpu.memory_space<smem>>
    %c2 = arith.constant 2 : index
    %2 = memref.load %arg1[%c2] : memref<3xf32, #tpu.memory_space<smem>>
    %c0_0 = arith.constant 0 : index
    %c0_1 = arith.constant 0 : index
    %3 = vector.load %arg2[%c0_0, %c0_1] : memref<16x128xf32, #tpu.memory_space<vmem>>, vector<16x128xf32>
    %c0_2 = arith.constant 0 : index
    %c0_3 = arith.constant 0 : index
    %4 = vector.load %arg3[%c0_2, %c0_3] : memref<16x128xf32, #tpu.memory_space<vmem>>, vector<16x128xf32>
    %5 = arith.subf %3, %4 : vector<16x128xf32>
    %6 = math.absf %5 : vector<16x128xf32>
    %7 = vector.broadcast %0 : f32 to vector<16x128xf32>
    %8 = arith.cmpf olt, %6, %7 : vector<16x128xf32>
    %9 = arith.mulf %6, %6 : vector<16x128xf32>
    %10 = vector.broadcast %2 : f32 to vector<16x128xf32>
    %11 = arith.mulf %9, %10 : vector<16x128xf32>
    %12 = vector.broadcast %1 : f32 to vector<16x128xf32>
    %13 = arith.addf %11, %12 : vector<16x128xf32>
    %14 = arith.select %8, %6, %13 : vector<16x128xi1>, vector<16x128xf32>
    %15 = vector.shape_cast %14 : vector<16x128xf32> to vector<2x8x128xf32>
    %cst = arith.constant dense<0.000000e+00> : vector<8x128xf32>
    %16 = vector.multi_reduction <add>, %15, %cst [0] : vector<2x8x128xf32> to vector<8x128xf32>
    %c0_4 = arith.constant 0 : index
    %c0_5 = arith.constant 0 : index
    %17 = vector.load %arg4[%c0_4, %c0_5] : memref<8x128xf32, #tpu.memory_space<vmem>>, vector<8x128xf32>
    tpu.vector_store %arg4[%c0_4, %c0_5], %16 {strides = array<i32>} : memref<8x128xf32, #tpu.memory_space<vmem>>, vector<8x128xf32>,
    return
  }
  func.func @transform_0(%arg0: i32) -> i32 {
    %c0_i32 = arith.constant 0 : i32
    %c0_i32_0 = arith.constant 0 : i32
    return %c0_i32 : i32
  }
  func.func @transform_1(%arg0: i32) -> (i32, i32) {
    %c0_i32 = arith.constant 0 : i32
    %c0_i32_0 = arith.constant 0 : i32
    return %arg0, %c0_i32 : i32, i32
  }
  func.func @transform_2(%arg0: i32) -> (i32, i32) {
    %c0_i32 = arith.constant 0 : i32
    %c0_i32_0 = arith.constant 0 : i32
    return %arg0, %c0_i32 : i32, i32
  }
  func.func @transform_3(%arg0: i32) -> (i32, i32) {
    %c0_i32 = arith.constant 0 : i32
    %c0_i32_0 = arith.constant 0 : i32
    return %arg0, %c0_i32 : i32, i32
  }
}

</mosaic_0001>

<bundles_post_ra>
// kernel: inverse_huber_loss.2
= control target key start
LH: loop header
LB: loop body
LE: loop exit
PB: predicated region body
PF: predicated region fallthrough
CT: control target
= control target key end

     0   :  { %s55_s0 = inlined_call_operand.vmem [shape: f32[16,128], index: 0, kind: input, shape index: {}]   ;;  %s56_s1 = inlined_call_operand.vmem [shape: f32[16,128], index: 1, kind: input, shape index: {}]   ;;  %s57_s2 = inlined_call_operand.vmem [shape: f32[8,128], index: 2, kind: output, shape index: {}]  }
   0x1   :  { %v11_v0 = vld [vmem:[%s55_s0] sm:$0xff]  ;;  %v12_v1 = vld [vmem:[%s55_s0 + $0x8] sm:$0xff] }
   0x2   :  { %v13_v2 = vld [vmem:[%s56_s1] sm:$0xff]  ;;  %v14_v3 = vld [vmem:[%s56_s1 + $0x8] sm:$0xff] }
   0x3   :  { %v15_v4 = vsub.f32 %v11_v0, %v13_v2  ;;  %v16_v5 = vsub.f32 %v12_v1, %v14_v3 }
   0x5   :  { %v17_v6 = vand.u32 2147483647, %v15_v4  ;;  %v18_v7 = vand.u32 2147483647, %v16_v5 }
   0x7   :  { %v19_v8 = vmax.f32.f32 %v17_v6, %v18_v7 }
   0x9   :  { %20 = vst [vmem:[%s57_s2] sm:$0xff] %v19_v8 }

// kernel: inverse_huber_loss.3
= control target key start
LH: loop header
LB: loop body
LE: loop exit
PB: predicated region body
PF: predicated region fallthrough
CT: control target
= control target key end

     0   :  { %8 = vsyncpa [#allocation3], 0  ;;  %s114_s0 = inlined_call_operand.vmem [shape: f32[3], index: 0, kind: input, shape index: {}]   ;;  %s115_s1 = inlined_call_operand.vmem [shape: f32[16,128], index: 1, kind: input, shape index: {}]   ;;  %s116_s2 = inlined_call_operand.vmem [shape: f32[16,128], index: 2, kind: input, shape index: {}]   ;;  %s117_s3 = inlined_call_operand.vmem [shape: f32[8,128], index: 3, kind: output, shape index: {}]  }
   0x1   :  { %s15_s14 = sshll.u32 %s114_s0, 4  ;;  %s16_s14 = int_to_ptr.vmem [resolvable:$true] %s15_s14 }
   0x2   :  { %s61_s15 = scalar_lea.vmem %s16_s14, 16  ;;  %p66_p1 = scmp.lt.s32.totalorder %s16_s14, %s16_s14 }
   0x3   :  { %p62_p0 = scmp.ne.s32.totalorder %s16_s14, %s61_s15  ;;  %p67_p2 = scmp.lt.s32.totalorder %s61_s15, %s61_s15 }
   0x5   :  { %p68_p3 = por %p67_p2, %p66_p1 }
   0x7   :  { %p69_p4 = pnand %p68_p3, %p62_p0 }
   0x9   :  { %72 = shalt.err (!%p69_p4)
}
   0xa   :  { %s75_s16 = smov [#allocation2]  }
   0xb   :  { %18 = dma.vmem_to_smem %s16_s14, 16, %s75_s16, [#allocation3]  }
   0xc   :  { %73 = dma.done.wait [#allocation3], 16  }
   0xd   :  { %74 = vsyncadd [#allocation3], 4294967280 }
   0xe   :  { %26 = sfence }
   0xf   :  { %s27_s17 = sld [smem:[#allocation2]]  ;;  %v30_v0 = vld [vmem:[%s115_s1] sm:$0xff]  ;;  %v31_v1 = vld [vmem:[%s115_s1 + $0x8] sm:$0xff] }
  0x10   :  { %v32_v2 = vld [vmem:[%s116_s2] sm:$0xff]  ;;  %s58_s23 = sld [smem:[#allocation2 + $0x1]]  ;;  %v33_v3 = vld [vmem:[%s116_s2 + $0x8] sm:$0xff] }
  0x11   :  { %v34_v4 = vsub.f32 %v30_v0, %v32_v2  ;;  %s59_s26 = sld [smem:[#allocation2 + $0x2]]  ;;  %v35_v5 = vsub.f32 %v31_v1, %v33_v3 }
  0x13   :  { %v36_v6 = vand.u32 2147483647, %v34_v4  ;;  %v37_v7 = vand.u32 2147483647, %v35_v5 }
  0x15   :  { %v41_v8 = vmul.f32 %v36_v6, %v36_v6  ;;  %v42_v9 = vmul.f32 %v37_v7, %v37_v7  ;;  %v38_v10 = vstv %s27_s17 }
  0x16   :  { %v46_v12 = vstv %s58_s23  ;;  %vm39_vm0 = vcmp.lt.f32.partialorder %v36_v6, %v38_v10  ;;  %vm40_vm1 = vcmp.lt.f32.partialorder %v37_v7, %v38_v10 }
  0x17   :  { %v43_v11 = vstv %s59_s26 }
  0x18   :  { %v44_v13 = vmul.f32 %v43_v11, %v41_v8  ;;  %v45_v14 = vmul.f32 %v43_v11, %v42_v9 }
  0x1a   :  { %v47_v15 = vadd.f32 %v46_v12, %v44_v13  ;;  %v48_v16 = vadd.f32 %v46_v12, %v45_v14 }
  0x1c   :  { %v49_v17 = vsel %vm39_vm0, %v36_v6, %v47_v15  ;;  %v50_v18 = vsel %vm40_vm1, %v37_v7, %v48_v16 }
  0x1d   :  { %v51_v19 = vadd.f32 %v50_v18, %v49_v17 }
  0x1f   :  { %52 = vst [vmem:[%s117_s3] sm:$0xff] %v51_v19 }
  0x20   :  { %57 = vsyncpa [#allocation3], 1 }

</bundles_post_ra>
